<compile_context>
chip_gen: v7x
topology: tpu7x:2x2x1
jax: 0.10.0
libtpu: 0.0.40
codegen_flags: <defaults>
</compile_context>

<pallas_src>
import jax
import jax.numpy as jnp
from jax.experimental import pallas as pl
from jax.experimental.pallas import tpu as pltpu


def _round_up(n, m):
    return ((n + m - 1) // m) * m


def _ae_kernel(x_ref,
               w1_ref, b1_ref,
               w2_ref, b2_ref,
               w3_ref, b3_ref,
               w4_ref, b4_ref,
               enc_ref, dec_ref):
    cdt = w1_ref.dtype                                   # MXU operand dtype (bf16)
    x = x_ref[...]                                       # (tb, D_p), bf16

    # encoder: Linear(D -> H) + ReLU
    h1 = jnp.dot(x, w1_ref[...], preferred_element_type=jnp.float32) + b1_ref[...]
    h1 = jnp.maximum(h1, 0.0)

    # encoder: Linear(H -> H//2) + ReLU     -> "encoded"
    enc = jnp.dot(h1.astype(cdt), w2_ref[...],
                  preferred_element_type=jnp.float32) + b2_ref[...]
    enc = jnp.maximum(enc, 0.0)
    enc_ref[...] = enc.astype(enc_ref.dtype)

    # decoder: Linear(H//2 -> H) + ReLU
    h3 = jnp.dot(enc.astype(cdt), w3_ref[...],
                 preferred_element_type=jnp.float32) + b3_ref[...]
    h3 = jnp.maximum(h3, 0.0)

    # decoder: Linear(H -> D) + Sigmoid     -> "decoded"
    dec = jnp.dot(h3.astype(cdt), w4_ref[...],
                  preferred_element_type=jnp.float32) + b4_ref[...]
    dec_ref[...] = jax.nn.sigmoid(dec).astype(dec_ref.dtype)


def _pick_tb(batch, d_p, h_p, hh_p, weight_bytes, budget_bytes):
    """Largest multiple-of-8 batch tile (<=512) whose VMEM footprint fits the budget."""
    tb = min(_round_up(batch, 8), 512)
    while tb > 8:
        act_bytes = (
            2 * tb * d_p * 2                        # double-buffered bf16 x tiles
            + 2 * tb * (hh_p + d_p) * 4             # double-buffered f32 output tiles
            + tb * (2 * h_p + hh_p + d_p) * 4       # in-flight f32 intermediates
        )
        if act_bytes + 2 * weight_bytes <= budget_bytes:
            break
        tb = max(8, _round_up(tb // 2, 8))
    return tb


def auto_encoder_forward(x, params, *, tb=None, compute_dtype=jnp.bfloat16,
                         vmem_budget_bytes=40 * 1024 * 1024):
    """x: [B, input_size] float32. params: dict of [in, out] weights and [1, out] biases.

    Returns (encoded [B, hidden//2], decoded [B, input_size]), both float32.
    """
    B, D = x.shape
    w1, b1 = params["w1"], params["b1"]   # (D, H),    (1, H)
    w2, b2 = params["w2"], params["b2"]   # (H, H//2), (1, H//2)
    w3, b3 = params["w3"], params["b3"]   # (H//2, H), (1, H)
    w4, b4 = params["w4"], params["b4"]   # (H, D),    (1, D)
    H, Hh = w1.shape[1], w2.shape[1]

    # --- pad feature dims to lane multiples of 128 (dense vregs / unmasked stores) ---
    D_p, H_p, Hh_p = (_round_up(n, 128) for n in (D, H, Hh))

    def pad2(a, rows, cols, dtype):
        return jnp.pad(a, ((0, rows - a.shape[0]), (0, cols - a.shape[1]))).astype(dtype)

    w1p = pad2(w1, D_p, H_p, compute_dtype)
    w2p = pad2(w2, H_p, Hh_p, compute_dtype)
    w3p = pad2(w3, Hh_p, H_p, compute_dtype)
    w4p = pad2(w4, H_p, D_p, compute_dtype)
    b1p = pad2(b1, 1, H_p, jnp.float32)
    b2p = pad2(b2, 1, Hh_p, jnp.float32)
    b3p = pad2(b3, 1, H_p, jnp.float32)
    b4p = pad2(b4, 1, D_p, jnp.float32)
    weights = (w1p, b1p, w2p, b2p, w3p, b3p, w4p, b4p)
    weight_bytes = sum(int(w.size) * w.dtype.itemsize for w in weights)

    # --- batch tile sized against a v7x-style (64 MiB / core) VMEM budget with headroom ---
    if tb is None:
        tb = _pick_tb(B, D_p, H_p, Hh_p, weight_bytes, vmem_budget_bytes)
    tb = _round_up(tb, 8)
    B_p = _round_up(B, tb)
    xp = jnp.pad(x, ((0, B_p - B), (0, D_p - D))).astype(compute_dtype)

    grid = (B_p // tb,)

    out_shapes = (
        jax.ShapeDtypeStruct((B_p, Hh_p), jnp.float32),
        jax.ShapeDtypeStruct((B_p, D_p), jnp.float32),
    )

    cost = pl.CostEstimate(
        flops=2 * B_p * (D_p * H_p + H_p * Hh_p + Hh_p * H_p + H_p * D_p),
        transcendentals=B_p * D_p,                    # sigmoid on the decoder output
        bytes_accessed=int(xp.size) * 2 + weight_bytes + B_p * (Hh_p + D_p) * 4,
    )

    def build_in_specs(single_buffer_weights):
        if single_buffer_weights:
            # constant-index weight/bias blocks do not need double buffering
            rep = lambda a: pl.BlockSpec(a.shape, lambda i: (0, 0),
                                         pipeline_mode=pl.Buffered(1))
        else:
            rep = lambda a: pl.BlockSpec(a.shape, lambda i: (0, 0))
        return [pl.BlockSpec((tb, D_p), lambda i: (i, 0))] + [rep(w) for w in weights]

    def run(in_specs):
        return pl.pallas_call(
            _ae_kernel,
            out_shape=out_shapes,
            grid_spec=pltpu.PrefetchScalarGridSpec(
                num_scalar_prefetch=0,
                grid=grid,
                in_specs=in_specs,
                out_specs=[
                    pl.BlockSpec((tb, Hh_p), lambda i: (i, 0)),   # encoded tile
                    pl.BlockSpec((tb, D_p), lambda i: (i, 0)),    # decoded tile
                ],
            ),
            compiler_params=pltpu.CompilerParams(
                dimension_semantics=("parallel",),
                vmem_limit_bytes=48 * 1024 * 1024,
            ),
            cost_estimate=cost,
        )(xp, *weights)

    try:
        enc_p, dec_p = run(build_in_specs(True))
    except Exception:
        # pipeline_mode=Buffered(1) not supported on this JAX/Mosaic build -> default buffering
        enc_p, dec_p = run(build_in_specs(False))

    return enc_p[:B, :Hh], dec_p[:B, :D]


def init_params(key, input_size, hidden_size):
    """Deterministic init mirroring PyTorch Linear's U(-1/sqrt(fan_in), 1/sqrt(fan_in)).

    Weights are stored pre-transposed as [in_features, out_features]."""
    def linear(key, fan_in, fan_out):
        kw, kb = jax.random.split(key)
        bound = 1.0 / jnp.sqrt(jnp.float32(fan_in))
        w = jax.random.uniform(kw, (fan_in, fan_out), jnp.float32, -bound, bound)
        b = jax.random.uniform(kb, (1, fan_out), jnp.float32, -bound, bound)
        return w, b

    k1, k2, k3, k4 = jax.random.split(key, 4)
    H, Hh = hidden_size, hidden_size // 2
    w1, b1 = linear(k1, input_size, H)
    w2, b2 = linear(k2, H, Hh)
    w3, b3 = linear(k3, Hh, H)
    w4, b4 = linear(k4, H, input_size)
    return dict(w1=w1, b1=b1, w2=w2, b2=b2, w3=w3, b3=b3, w4=w4, b4=b4)


def _reference_forward(x, p):
    relu = lambda v: jnp.maximum(v, 0.0)
    h1 = relu(x @ p["w1"] + p["b1"])
    enc = relu(h1 @ p["w2"] + p["b2"])
    h3 = relu(enc @ p["w3"] + p["b3"])
    dec = jax.nn.sigmoid(h3 @ p["w4"] + p["b4"])
    return enc, dec


if __name__ == "__main__":
    batch = 8
    input_size = 64
    hidden_size = 32

    key = jax.random.PRNGKey(0)
    kx, kp = jax.random.split(key)
    x = jax.random.normal(kx, (batch, input_size), jnp.float32)
    params = init_params(kp, input_size, hidden_size)

    enc, dec = auto_encoder_forward(x, params)
    enc, dec = jax.block_until_ready((enc, dec))

    # sanity check against a pure-f32 JAX reference (bf16 MXU operands -> loose tolerance)
    enc_ref, dec_ref = _reference_forward(x, params)
    assert enc.shape == (batch, hidden_size // 2)
    assert dec.shape == (batch, input_size)
    assert jnp.allclose(enc, enc_ref, atol=5e-2, rtol=5e-2)
    assert jnp.allclose(dec, dec_ref, atol=5e-2, rtol=5e-2)

    print("KERNEL_OK")
</pallas_src>

<mosaic_0001>
module attributes {stable_mosaic.version = 11 : i64} {
  func.func @_ae_kernel(%arg0: i32, %arg1: memref<8x128xbf16, #tpu.memory_space<vmem>>, %arg2: memref<128x128xbf16, #tpu.memory_space<vmem>>, %arg3: memref<1x128xf32, #tpu.memory_space<vmem>>, %arg4: memref<128x128xbf16, #tpu.memory_space<vmem>>, %arg5: memref<1x128xf32, #tpu.memory_space<vmem>>, %arg6: memref<128x128xbf16, #tpu.memory_space<vmem>>, %arg7: memref<1x128xf32, #tpu.memory_space<vmem>>, %arg8: memref<128x128xbf16, #tpu.memory_space<vmem>>, %arg9: memref<1x128xf32, #tpu.memory_space<vmem>>, %arg10: memref<8x128xf32, #tpu.memory_space<vmem>>, %arg11: memref<8x128xf32, #tpu.memory_space<vmem>>) attributes {dimension_semantics = [#tpu.dimension_semantics<parallel>], iteration_bounds = array<i64: 1>, scalar_prefetch = 0 : i64, scratch_operands = 0 : i64, tpu.core_type = #tpu.core_type<tc>, window_params = [{transform_indices = @transform_0, window_bounds = array<i64: 8, 128>}, {pipeline_mode = #tpu.pipeline_mode<synchronous>, transform_indices = @transform_1, window_bounds = array<i64: 128, 128>}, {pipeline_mode = #tpu.pipeline_mode<synchronous>, transform_indices = @transform_2, window_bounds = array<i64: 1, 128>}, {pipeline_mode = #tpu.pipeline_mode<synchronous>, transform_indices = @transform_3, window_bounds = array<i64: 128, 128>}, {pipeline_mode = #tpu.pipeline_mode<synchronous>, transform_indices = @transform_4, window_bounds = array<i64: 1, 128>}, {pipeline_mode = #tpu.pipeline_mode<synchronous>, transform_indices = @transform_5, window_bounds = array<i64: 128, 128>}, {pipeline_mode = #tpu.pipeline_mode<synchronous>, transform_indices = @transform_6, window_bounds = array<i64: 1, 128>}, {pipeline_mode = #tpu.pipeline_mode<synchronous>, transform_indices = @transform_7, window_bounds = array<i64: 128, 128>}, {pipeline_mode = #tpu.pipeline_mode<synchronous>, transform_indices = @transform_8, window_bounds = array<i64: 1, 128>}, {transform_indices = @transform_9, window_bounds = array<i64: 8, 128>}, {transform_indices = @transform_10, window_bounds = array<i64: 8, 128>}]} {
    %c0 = arith.constant 0 : index
    %c0_0 = arith.constant 0 : index
    %0 = vector.load %arg1[%c0, %c0_0] : memref<8x128xbf16, #tpu.memory_space<vmem>>, vector<8x128xbf16>
    %c0_1 = arith.constant 0 : index
    %c0_2 = arith.constant 0 : index
    %1 = vector.load %arg2[%c0_1, %c0_2] : memref<128x128xbf16, #tpu.memory_space<vmem>>, vector<128x128xbf16>
    %cst = arith.constant dense<0.000000e+00> : vector<8x128xf32>
    %2 = tpu.matmul %0, %1, %cst {dimension_numbers = #tpu.dot_dimension_numbers<[1], [0], [0], [1], [0, 0, 1, 1], [], []>} : vector<8x128xbf16>, vector<128x128xbf16>, vector<8x128xf32> -> vector<8x128xf32>
    %c0_3 = arith.constant 0 : index
    %c0_4 = arith.constant 0 : index
    %3 = vector.load %arg3[%c0_3, %c0_4] : memref<1x128xf32, #tpu.memory_space<vmem>>, vector<1x128xf32>
    %4 = vector.broadcast %3 : vector<1x128xf32> to vector<8x128xf32>
    %5 = arith.addf %2, %4 : vector<8x128xf32>
    %cst_5 = arith.constant 0.000000e+00 : f32
    %6 = vector.broadcast %cst_5 : f32 to vector<8x128xf32>
    %7 = arith.maximumf %5, %6 : vector<8x128xf32>
    %8 = arith.truncf %7 : vector<8x128xf32> to vector<8x128xbf16>
    %c0_6 = arith.constant 0 : index
    %c0_7 = arith.constant 0 : index
    %9 = vector.load %arg4[%c0_6, %c0_7] : memref<128x128xbf16, #tpu.memory_space<vmem>>, vector<128x128xbf16>
    %cst_8 = arith.constant dense<0.000000e+00> : vector<8x128xf32>
    %10 = tpu.matmul %8, %9, %cst_8 {dimension_numbers = #tpu.dot_dimension_numbers<[1], [0], [0], [1], [0, 0, 1, 1], [], []>} : vector<8x128xbf16>, vector<128x128xbf16>, vector<8x128xf32> -> vector<8x128xf32>
    %c0_9 = arith.constant 0 : index
    %c0_10 = arith.constant 0 : index
    %11 = vector.load %arg5[%c0_9, %c0_10] : memref<1x128xf32, #tpu.memory_space<vmem>>, vector<1x128xf32>
    %12 = vector.broadcast %11 : vector<1x128xf32> to vector<8x128xf32>
    %13 = arith.addf %10, %12 : vector<8x128xf32>
    %cst_11 = arith.constant 0.000000e+00 : f32
    %14 = vector.broadcast %cst_11 : f32 to vector<8x128xf32>
    %15 = arith.maximumf %13, %14 : vector<8x128xf32>
    %c0_12 = arith.constant 0 : index
    %c0_13 = arith.constant 0 : index
    %16 = vector.load %arg10[%c0_12, %c0_13] : memref<8x128xf32, #tpu.memory_space<vmem>>, vector<8x128xf32>
    tpu.vector_store %arg10[%c0_12, %c0_13], %15 {strides = array<i32>} : memref<8x128xf32, #tpu.memory_space<vmem>>, vector<8x128xf32>,
    %17 = arith.truncf %15 : vector<8x128xf32> to vector<8x128xbf16>
    %c0_14 = arith.constant 0 : index
    %c0_15 = arith.constant 0 : index
    %18 = vector.load %arg6[%c0_14, %c0_15] : memref<128x128xbf16, #tpu.memory_space<vmem>>, vector<128x128xbf16>
    %cst_16 = arith.constant dense<0.000000e+00> : vector<8x128xf32>
    %19 = tpu.matmul %17, %18, %cst_16 {dimension_numbers = #tpu.dot_dimension_numbers<[1], [0], [0], [1], [0, 0, 1, 1], [], []>} : vector<8x128xbf16>, vector<128x128xbf16>, vector<8x128xf32> -> vector<8x128xf32>
    %c0_17 = arith.constant 0 : index
    %c0_18 = arith.constant 0 : index
    %20 = vector.load %arg7[%c0_17, %c0_18] : memref<1x128xf32, #tpu.memory_space<vmem>>, vector<1x128xf32>
    %21 = vector.broadcast %20 : vector<1x128xf32> to vector<8x128xf32>
    %22 = arith.addf %19, %21 : vector<8x128xf32>
    %cst_19 = arith.constant 0.000000e+00 : f32
    %23 = vector.broadcast %cst_19 : f32 to vector<8x128xf32>
    %24 = arith.maximumf %22, %23 : vector<8x128xf32>
    %25 = arith.truncf %24 : vector<8x128xf32> to vector<8x128xbf16>
    %c0_20 = arith.constant 0 : index
    %c0_21 = arith.constant 0 : index
    %26 = vector.load %arg8[%c0_20, %c0_21] : memref<128x128xbf16, #tpu.memory_space<vmem>>, vector<128x128xbf16>
    %cst_22 = arith.constant dense<0.000000e+00> : vector<8x128xf32>
    %27 = tpu.matmul %25, %26, %cst_22 {dimension_numbers = #tpu.dot_dimension_numbers<[1], [0], [0], [1], [0, 0, 1, 1], [], []>} : vector<8x128xbf16>, vector<128x128xbf16>, vector<8x128xf32> -> vector<8x128xf32>
    %c0_23 = arith.constant 0 : index
    %c0_24 = arith.constant 0 : index
    %28 = vector.load %arg9[%c0_23, %c0_24] : memref<1x128xf32, #tpu.memory_space<vmem>>, vector<1x128xf32>
    %29 = vector.broadcast %28 : vector<1x128xf32> to vector<8x128xf32>
    %30 = arith.addf %27, %29 : vector<8x128xf32>
    %31 = arith.negf %30 : vector<8x128xf32>
    %32 = math.exp %31 : vector<8x128xf32>
    %cst_25 = arith.constant 1.000000e+00 : f32
    %33 = vector.broadcast %cst_25 : f32 to vector<8x128xf32>
    %34 = arith.addf %33, %32 : vector<8x128xf32>
    %35 = arith.divf %33, %34 : vector<8x128xf32>
    %c0_26 = arith.constant 0 : index
    %c0_27 = arith.constant 0 : index
    %36 = vector.load %arg11[%c0_26, %c0_27] : memref<8x128xf32, #tpu.memory_space<vmem>>, vector<8x128xf32>
    tpu.vector_store %arg11[%c0_26, %c0_27], %35 {strides = array<i32>} : memref<8x128xf32, #tpu.memory_space<vmem>>, vector<8x128xf32>,
    return
  }
  func.func @transform_0(%arg0: i32) -> (i32, i32) {
    %c0_i32 = arith.constant 0 : i32
    %c0_i32_0 = arith.constant 0 : i32
    return %arg0, %c0_i32 : i32, i32
  }
  func.func @transform_1(%arg0: i32) -> (i32, i32) {
    %c0_i32 = arith.constant 0 : i32
    %c0_i32_0 = arith.constant 0 : i32
    %c0_i32_1 = arith.constant 0 : i32
    return %c0_i32, %c0_i32_0 : i32, i32
  }
  func.func @transform_2(%arg0: i32) -> (i32, i32) {
    %c0_i32 = arith.constant 0 : i32
    %c0_i32_0 = arith.constant 0 : i32
    %c0_i32_1 = arith.constant 0 : i32
    return %c0_i32, %c0_i32_0 : i32, i32
  }
  func.func @transform_3(%arg0: i32) -> (i32, i32) {
    %c0_i32 = arith.constant 0 : i32
    %c0_i32_0 = arith.constant 0 : i32
    %c0_i32_1 = arith.constant 0 : i32
    return %c0_i32, %c0_i32_0 : i32, i32
  }
  func.func @transform_4(%arg0: i32) -> (i32, i32) {
    %c0_i32 = arith.constant 0 : i32
    %c0_i32_0 = arith.constant 0 : i32
    %c0_i32_1 = arith.constant 0 : i32
    return %c0_i32, %c0_i32_0 : i32, i32
  }
  func.func @transform_5(%arg0: i32) -> (i32, i32) {
    %c0_i32 = arith.constant 0 : i32
    %c0_i32_0 = arith.constant 0 : i32
    %c0_i32_1 = arith.constant 0 : i32
    return %c0_i32, %c0_i32_0 : i32, i32
  }
  func.func @transform_6(%arg0: i32) -> (i32, i32) {
    %c0_i32 = arith.constant 0 : i32
    %c0_i32_0 = arith.constant 0 : i32
    %c0_i32_1 = arith.constant 0 : i32
    return %c0_i32, %c0_i32_0 : i32, i32
  }
  func.func @transform_7(%arg0: i32) -> (i32, i32) {
    %c0_i32 = arith.constant 0 : i32
    %c0_i32_0 = arith.constant 0 : i32
    %c0_i32_1 = arith.constant 0 : i32
    return %c0_i32, %c0_i32_0 : i32, i32
  }
  func.func @transform_8(%arg0: i32) -> (i32, i32) {
    %c0_i32 = arith.constant 0 : i32
    %c0_i32_0 = arith.constant 0 : i32
    %c0_i32_1 = arith.constant 0 : i32
    return %c0_i32, %c0_i32_0 : i32, i32
  }
  func.func @transform_9(%arg0: i32) -> (i32, i32) {
    %c0_i32 = arith.constant 0 : i32
    %c0_i32_0 = arith.constant 0 : i32
    return %arg0, %c0_i32 : i32, i32
  }
  func.func @transform_10(%arg0: i32) -> (i32, i32) {
    %c0_i32 = arith.constant 0 : i32
    %c0_i32_0 = arith.constant 0 : i32
    return %arg0, %c0_i32 : i32, i32
  }
}

module attributes {stable_mosaic.version = 11 : i64} {
  func.func @_ae_kernel(%arg0: i32, %arg1: memref<8x128xbf16, #tpu.memory_space<vmem>>, %arg2: memref<128x128xbf16, #tpu.memory_space<vmem>>, %arg3: memref<1x128xf32, #tpu.memory_space<vmem>>, %arg4: memref<128x128xbf16, #tpu.memory_space<vmem>>, %arg5: memref<1x128xf32, #tpu.memory_space<vmem>>, %arg6: memref<128x128xbf16, #tpu.memory_space<vmem>>, %arg7: memref<1x128xf32, #tpu.memory_space<vmem>>, %arg8: memref<128x128xbf16, #tpu.memory_space<vmem>>, %arg9: memref<1x128xf32, #tpu.memory_space<vmem>>, %arg10: memref<8x128xf32, #tpu.memory_space<vmem>>, %arg11: memref<8x128xf32, #tpu.memory_space<vmem>>) attributes {dimension_semantics = [#tpu.dimension_semantics<parallel>], iteration_bounds = array<i64: 1>, scalar_prefetch = 0 : i64, scratch_operands = 0 : i64, tpu.core_type = #tpu.core_type<tc>, window_params = [{transform_indices = @transform_0, window_bounds = array<i64: 8, 128>}, {pipeline_mode = #tpu.pipeline_mode<synchronous>, transform_indices = @transform_1, window_bounds = array<i64: 128, 128>}, {pipeline_mode = #tpu.pipeline_mode<synchronous>, transform_indices = @transform_2, window_bounds = array<i64: 1, 128>}, {pipeline_mode = #tpu.pipeline_mode<synchronous>, transform_indices = @transform_3, window_bounds = array<i64: 128, 128>}, {pipeline_mode = #tpu.pipeline_mode<synchronous>, transform_indices = @transform_4, window_bounds = array<i64: 1, 128>}, {pipeline_mode = #tpu.pipeline_mode<synchronous>, transform_indices = @transform_5, window_bounds = array<i64: 128, 128>}, {pipeline_mode = #tpu.pipeline_mode<synchronous>, transform_indices = @transform_6, window_bounds = array<i64: 1, 128>}, {pipeline_mode = #tpu.pipeline_mode<synchronous>, transform_indices = @transform_7, window_bounds = array<i64: 128, 128>}, {pipeline_mode = #tpu.pipeline_mode<synchronous>, transform_indices = @transform_8, window_bounds = array<i64: 1, 128>}, {transform_indices = @transform_9, window_bounds = array<i64: 8, 128>}, {transform_indices = @transform_10, window_bounds = array<i64: 8, 128>}]} {
    %c0 = arith.constant 0 : index
    %c0_0 = arith.constant 0 : index
    %0 = vector.load %arg1[%c0, %c0_0] : memref<8x128xbf16, #tpu.memory_space<vmem>>, vector<8x128xbf16>
    %c0_1 = arith.constant 0 : index
    %c0_2 = arith.constant 0 : index
    %1 = vector.load %arg2[%c0_1, %c0_2] : memref<128x128xbf16, #tpu.memory_space<vmem>>, vector<128x128xbf16>
    %cst = arith.constant dense<0.000000e+00> : vector<8x128xf32>
    %2 = tpu.matmul %0, %1, %cst {dimension_numbers = #tpu.dot_dimension_numbers<[1], [0], [0], [1], [0, 0, 1, 1], [], []>} : vector<8x128xbf16>, vector<128x128xbf16>, vector<8x128xf32> -> vector<8x128xf32>
    %c0_3 = arith.constant 0 : index
    %c0_4 = arith.constant 0 : index
    %3 = vector.load %arg3[%c0_3, %c0_4] : memref<1x128xf32, #tpu.memory_space<vmem>>, vector<1x128xf32>
    %4 = vector.broadcast %3 : vector<1x128xf32> to vector<8x128xf32>
    %5 = arith.addf %2, %4 : vector<8x128xf32>
    %cst_5 = arith.constant 0.000000e+00 : f32
    %6 = vector.broadcast %cst_5 : f32 to vector<8x128xf32>
    %7 = arith.maximumf %5, %6 : vector<8x128xf32>
    %8 = arith.truncf %7 : vector<8x128xf32> to vector<8x128xbf16>
    %c0_6 = arith.constant 0 : index
    %c0_7 = arith.constant 0 : index
    %9 = vector.load %arg4[%c0_6, %c0_7] : memref<128x128xbf16, #tpu.memory_space<vmem>>, vector<128x128xbf16>
    %cst_8 = arith.constant dense<0.000000e+00> : vector<8x128xf32>
    %10 = tpu.matmul %8, %9, %cst_8 {dimension_numbers = #tpu.dot_dimension_numbers<[1], [0], [0], [1], [0, 0, 1, 1], [], []>} : vector<8x128xbf16>, vector<128x128xbf16>, vector<8x128xf32> -> vector<8x128xf32>
    %c0_9 = arith.constant 0 : index
    %c0_10 = arith.constant 0 : index
    %11 = vector.load %arg5[%c0_9, %c0_10] : memref<1x128xf32, #tpu.memory_space<vmem>>, vector<1x128xf32>
    %12 = vector.broadcast %11 : vector<1x128xf32> to vector<8x128xf32>
    %13 = arith.addf %10, %12 : vector<8x128xf32>
    %cst_11 = arith.constant 0.000000e+00 : f32
    %14 = vector.broadcast %cst_11 : f32 to vector<8x128xf32>
    %15 = arith.maximumf %13, %14 : vector<8x128xf32>
    %c0_12 = arith.constant 0 : index
    %c0_13 = arith.constant 0 : index
    %16 = vector.load %arg10[%c0_12, %c0_13] : memref<8x128xf32, #tpu.memory_space<vmem>>, vector<8x128xf32>
    tpu.vector_store %arg10[%c0_12, %c0_13], %15 {strides = array<i32>} : memref<8x128xf32, #tpu.memory_space<vmem>>, vector<8x128xf32>,
    %17 = arith.truncf %15 : vector<8x128xf32> to vector<8x128xbf16>
    %c0_14 = arith.constant 0 : index
    %c0_15 = arith.constant 0 : index
    %18 = vector.load %arg6[%c0_14, %c0_15] : memref<128x128xbf16, #tpu.memory_space<vmem>>, vector<128x128xbf16>
    %cst_16 = arith.constant dense<0.000000e+00> : vector<8x128xf32>
    %19 = tpu.matmul %17, %18, %cst_16 {dimension_numbers = #tpu.dot_dimension_numbers<[1], [0], [0], [1], [0, 0, 1, 1], [], []>} : vector<8x128xbf16>, vector<128x128xbf16>, vector<8x128xf32> -> vector<8x128xf32>
    %c0_17 = arith.constant 0 : index
    %c0_18 = arith.constant 0 : index
    %20 = vector.load %arg7[%c0_17, %c0_18] : memref<1x128xf32, #tpu.memory_space<vmem>>, vector<1x128xf32>
    %21 = vector.broadcast %20 : vector<1x128xf32> to vector<8x128xf32>
    %22 = arith.addf %19, %21 : vector<8x128xf32>
    %cst_19 = arith.constant 0.000000e+00 : f32
    %23 = vector.broadcast %cst_19 : f32 to vector<8x128xf32>
    %24 = arith.maximumf %22, %23 : vector<8x128xf32>
    %25 = arith.truncf %24 : vector<8x128xf32> to vector<8x128xbf16>
    %c0_20 = arith.constant 0 : index
    %c0_21 = arith.constant 0 : index
    %26 = vector.load %arg8[%c0_20, %c0_21] : memref<128x128xbf16, #tpu.memory_space<vmem>>, vector<128x128xbf16>
    %cst_22 = arith.constant dense<0.000000e+00> : vector<8x128xf32>
    %27 = tpu.matmul %25, %26, %cst_22 {dimension_numbers = #tpu.dot_dimension_numbers<[1], [0], [0], [1], [0, 0, 1, 1], [], []>} : vector<8x128xbf16>, vector<128x128xbf16>, vector<8x128xf32> -> vector<8x128xf32>
    %c0_23 = arith.constant 0 : index
    %c0_24 = arith.constant 0 : index
    %28 = vector.load %arg9[%c0_23, %c0_24] : memref<1x128xf32, #tpu.memory_space<vmem>>, vector<1x128xf32>
    %29 = vector.broadcast %28 : vector<1x128xf32> to vector<8x128xf32>
    %30 = arith.addf %27, %29 : vector<8x128xf32>
    %31 = arith.negf %30 : vector<8x128xf32>
    %32 = math.exp %31 : vector<8x128xf32>
    %cst_25 = arith.constant 1.000000e+00 : f32
    %33 = vector.broadcast %cst_25 : f32 to vector<8x128xf32>
    %34 = arith.addf %33, %32 : vector<8x128xf32>
    %35 = arith.divf %33, %34 : vector<8x128xf32>
    %c0_26 = arith.constant 0 : index
    %c0_27 = arith.constant 0 : index
    %36 = vector.load %arg11[%c0_26, %c0_27] : memref<8x128xf32, #tpu.memory_space<vmem>>, vector<8x128xf32>
    tpu.vector_store %arg11[%c0_26, %c0_27], %35 {strides = array<i32>} : memref<8x128xf32, #tpu.memory_space<vmem>>, vector<8x128xf32>,
    return
  }
  func.func @transform_0(%arg0: i32) -> (i32, i32) {
    %c0_i32 = arith.constant 0 : i32
    %c0_i32_0 = arith.constant 0 : i32
    return %arg0, %c0_i32 : i32, i32
  }
  func.func @transform_1(%arg0: i32) -> (i32, i32) {
    %c0_i32 = arith.constant 0 : i32
    %c0_i32_0 = arith.constant 0 : i32
    %c0_i32_1 = arith.constant 0 : i32
    return %c0_i32, %c0_i32_0 : i32, i32
  }
  func.func @transform_2(%arg0: i32) -> (i32, i32) {
    %c0_i32 = arith.constant 0 : i32
    %c0_i32_0 = arith.constant 0 : i32
    %c0_i32_1 = arith.constant 0 : i32
    return %c0_i32, %c0_i32_0 : i32, i32
  }
  func.func @transform_3(%arg0: i32) -> (i32, i32) {
    %c0_i32 = arith.constant 0 : i32
    %c0_i32_0 = arith.constant 0 : i32
    %c0_i32_1 = arith.constant 0 : i32
    return %c0_i32, %c0_i32_0 : i32, i32
  }
  func.func @transform_4(%arg0: i32) -> (i32, i32) {
    %c0_i32 = arith.constant 0 : i32
    %c0_i32_0 = arith.constant 0 : i32
    %c0_i32_1 = arith.constant 0 : i32
    return %c0_i32, %c0_i32_0 : i32, i32
  }
  func.func @transform_5(%arg0: i32) -> (i32, i32) {
    %c0_i32 = arith.constant 0 : i32
    %c0_i32_0 = arith.constant 0 : i32
    %c0_i32_1 = arith.constant 0 : i32
    return %c0_i32, %c0_i32_0 : i32, i32
  }
  func.func @transform_6(%arg0: i32) -> (i32, i32) {
    %c0_i32 = arith.constant 0 : i32
    %c0_i32_0 = arith.constant 0 : i32
    %c0_i32_1 = arith.constant 0 : i32
    return %c0_i32, %c0_i32_0 : i32, i32
  }
  func.func @transform_7(%arg0: i32) -> (i32, i32) {
    %c0_i32 = arith.constant 0 : i32
    %c0_i32_0 = arith.constant 0 : i32
    %c0_i32_1 = arith.constant 0 : i32
    return %c0_i32, %c0_i32_0 : i32, i32
  }
  func.func @transform_8(%arg0: i32) -> (i32, i32) {
    %c0_i32 = arith.constant 0 : i32
    %c0_i32_0 = arith.constant 0 : i32
    %c0_i32_1 = arith.constant 0 : i32
    return %c0_i32, %c0_i32_0 : i32, i32
  }
  func.func @transform_9(%arg0: i32) -> (i32, i32) {
    %c0_i32 = arith.constant 0 : i32
    %c0_i32_0 = arith.constant 0 : i32
    return %arg0, %c0_i32 : i32, i32
  }
  func.func @transform_10(%arg0: i32) -> (i32, i32) {
    %c0_i32 = arith.constant 0 : i32
    %c0_i32_0 = arith.constant 0 : i32
    return %arg0, %c0_i32 : i32, i32
  }
}

</mosaic_0001>

<bundles_post_ra>
// kernel: tpu_custom_call.1
= control target key start
LH: loop header
LB: loop body
LE: loop exit
PB: predicated region body
PF: predicated region fallthrough
CT: control target
= control target key end

     0   :  { %16 = vsyncpa [#allocation3], 0  ;;  %s1171_s0 = inlined_call_operand.hbm [shape: bf16[8,128], index: 0, kind: input, shape index: {}]   ;;  %s1172_s1 = inlined_call_operand.hbm [shape: bf16[128,128], index: 1, kind: input, shape index: {}]   ;;  %s1173_s2 = inlined_call_operand.vmem [shape: f32[1,128], index: 2, kind: input, shape index: {}]   ;;  %s1174_s3 = inlined_call_operand.hbm [shape: bf16[128,128], index: 3, kind: input, shape index: {}]   ;;  %s1175_s4 = inlined_call_operand.vmem [shape: f32[1,128], index: 4, kind: input, shape index: {}]   ;;  %s1176_s5 = inlined_call_operand.hbm [shape: bf16[128,128], index: 5, kind: input, shape index: {}]   ;;  %s1177_s6 = inlined_call_operand.vmem [shape: f32[1,128], index: 6, kind: input, shape index: {}]   ;;  %s1178_s7 = inlined_call_operand.hbm [shape: bf16[128,128], index: 7, kind: input, shape index: {}]   ;;  %s1179_s8 = inlined_call_operand.vmem [shape: f32[1,128], index: 8, kind: input, shape index: {}]   ;;  %s1180_s9 = inlined_call_operand.hbm [shape: f32[8,128], index: 9, kind: output, shape index: {0}]   ;;  %s1181_s10 = inlined_call_operand.hbm [shape: f32[8,128], index: 10, kind: output, shape index: {1}]  }
   0x1   :  { %17 = vsyncpa [#allocation6], 0 }
   0x2   :  { %18 = vsyncpa [#allocation9], 0 }
   0x3   :  { %19 = vsyncpa [#allocation4], 0 }
   0x4   :  { %20 = vsyncpa [#allocation13], 0  ;;  %s957_s13 = smov [#allocation5]   ;;  %s793_s17 = scalar_lea.hbm %s1172_s1, 1024 }
   0x5   :  { %s36_s14 = sshll.u32 %s957_s13, 4  ;;  %p794_p0 = scmp.ne.s32.totalorder %s1172_s1, %s793_s17  ;;  %s37_s14 = int_to_ptr.vmem [resolvable:$true] %s36_s14 }
   0x6   :  { %p797_p1 = scmp.lt.u32.totalorder %s793_s17, %s1172_s1 }
   0x8   :  { %p799_p2 = pnand %p797_p1, %p794_p0 }
   0xa   :  { %802 = shalt.err (!%p799_p2)
}
   0xb   :  { %s803_s22 = scalar_lea.vmem %s37_s14, 1024  ;;  %p808_p4 = scmp.lt.s32.totalorder %s37_s14, %s37_s14 }
   0xc   :  { %p804_p3 = scmp.ne.s32.totalorder %s37_s14, %s803_s22  ;;  %p809_p5 = scmp.lt.s32.totalorder %s803_s22, %s803_s22 }
   0xe   :  { %p810_p6 = por %p809_p5, %p808_p4 }
  0x10   :  { %p811_p7 = pnand %p810_p6, %p804_p3 }
  0x12   :  { %814 = shalt.err (!%p811_p7)
}
  0x13   :  { %s958_s23 = smov 64   ;;  %s959_s24 = smov 4  }
  0x14   :  { %42 = dma.hbm_to_vmem [thread:$0]  %s1172_s1, 1024, %s37_s14, [#allocation6], %s958_s23, %s958_s23, %s959_s24  }
  0x15   :  { %s960_s27 = smov [#allocation8]   ;;  %s961_s29 = smov [#allocation2]  }
  0x16   :  { %s64_s28 = sshll.u32 %s960_s27, 4  ;;  %s27_s30 = sshll.u32 %s961_s29, 4  ;;  %s65_s28 = int_to_ptr.vmem [resolvable:$true] %s64_s28  ;;  %s28_s30 = int_to_ptr.vmem [resolvable:$true] %s27_s30 }
  0x17   :  { %s815_s13 = scalar_lea.hbm %s1176_s5, 1024 }
  0x18   :  { %p816_p8 = scmp.ne.s32.totalorder %s1176_s5, %s815_s13  ;;  %p819_p9 = scmp.lt.u32.totalorder %s815_s13, %s1176_s5 }
  0x1a   :  { %p821_p10 = pnand %p819_p9, %p816_p8 }
  0x1c   :  { %824 = shalt.err (!%p821_p10)
}
  0x1d   :  { %s825_s1 = scalar_lea.vmem %s65_s28, 1024  ;;  %p830_p12 = scmp.lt.s32.totalorder %s65_s28, %s65_s28 }
  0x1e   :  { %p826_p11 = scmp.ne.s32.totalorder %s65_s28, %s825_s1  ;;  %p831_p13 = scmp.lt.s32.totalorder %s825_s1, %s825_s1 }
  0x20   :  { %p832_p0 = por %p831_p13, %p830_p12 }
  0x22   :  { %p833_p1 = pnand %p832_p0, %p826_p11 }
  0x24   :  { %836 = shalt.err (!%p833_p1)
}
  0x25   :  { %70 = dma.hbm_to_vmem [thread:$0]  %s1176_s5, 1024, %s65_s28, [#allocation9], %s958_s23, %s958_s23, %s959_s24  }
  0x26   :  { %s837_s22 = scalar_lea.hbm %s1171_s0, 64 }
  0x27   :  { %p838_p2 = scmp.ne.s32.totalorder %s1171_s0, %s837_s22  ;;  %p841_p3 = scmp.lt.u32.totalorder %s837_s22, %s1171_s0 }
  0x29   :  { %p843_p4 = pnand %p841_p3, %p838_p2 }
  0x2b   :  { %846 = shalt.err (!%p843_p4)
}
  0x2c   :  { %s847_s11 = scalar_lea.vmem %s28_s30, 64  ;;  %p852_p6 = scmp.lt.s32.totalorder %s28_s30, %s28_s30 }
  0x2d   :  { %p848_p5 = scmp.ne.s32.totalorder %s28_s30, %s847_s11  ;;  %p853_p7 = scmp.lt.s32.totalorder %s847_s11, %s847_s11 }
  0x2f   :  { %p854_p8 = por %p853_p7, %p852_p6 }
  0x31   :  { %p855_p9 = pnand %p854_p8, %p848_p5 }
  0x33   :  { %858 = shalt.err (!%p855_p9)
}
  0x34   :  { %30 = dma.hbm_to_vmem [thread:$0]  %s1171_s0, 64, %s28_s30, [#allocation3]  }
  0x35   :  { %s962_s12 = smov [#allocation7]   ;;  %s963_s15 = smov [#allocation10]  }
  0x36   :  { %s50_s13 = sshll.u32 %s962_s12, 4  ;;  %s78_s16 = sshll.u32 %s963_s15, 4  ;;  %s51_s13 = int_to_ptr.vmem [resolvable:$true] %s50_s13  ;;  %s79_s16 = int_to_ptr.vmem [resolvable:$true] %s78_s16 }
  0x37   :  { %s859_s1 = scalar_lea.hbm %s1174_s3, 1024 }
  0x38   :  { %p860_p10 = scmp.ne.s32.totalorder %s1174_s3, %s859_s1  ;;  %p863_p11 = scmp.lt.u32.totalorder %s859_s1, %s1174_s3 }
  0x3a   :  { %p865_p12 = pnand %p863_p11, %p860_p10 }
  0x3c   :  { %868 = shalt.err (!%p865_p12)
}
  0x3d   :  { %s869_s0 = scalar_lea.vmem %s51_s13, 1024  ;;  %p874_p0 = scmp.lt.s32.totalorder %s51_s13, %s51_s13 }
  0x3e   :  { %p870_p13 = scmp.ne.s32.totalorder %s51_s13, %s869_s0  ;;  %p875_p1 = scmp.lt.s32.totalorder %s869_s0, %s869_s0 }
  0x40   :  { %p876_p2 = por %p875_p1, %p874_p0 }
  0x42   :  { %p877_p3 = pnand %p876_p2, %p870_p13 }
  0x44   :  { %880 = shalt.err (!%p877_p3)
}
  0x45   :  { %56 = dma.hbm_to_vmem [thread:$0]  %s1174_s3, 1024, %s51_s13, [#allocation6], %s958_s23, %s958_s23, %s959_s24  }
  0x46   :  { %s881_s27 = scalar_lea.hbm %s1178_s7, 1024 }
  0x47   :  { %p882_p4 = scmp.ne.s32.totalorder %s1178_s7, %s881_s27  ;;  %p885_p5 = scmp.lt.u32.totalorder %s881_s27, %s1178_s7 }
  0x49   :  { %p887_p6 = pnand %p885_p5, %p882_p4 }
  0x4b   :  { %890 = shalt.err (!%p887_p6)
}
  0x4c   :  { %s891_s12 = scalar_lea.vmem %s79_s16, 1024  ;;  %p896_p8 = scmp.lt.s32.totalorder %s79_s16, %s79_s16 }
  0x4d   :  { %p892_p7 = scmp.ne.s32.totalorder %s79_s16, %s891_s12  ;;  %p897_p9 = scmp.lt.s32.totalorder %s891_s12, %s891_s12 }
  0x4f   :  { %p898_p10 = por %p897_p9, %p896_p8 }
  0x51   :  { %p899_p11 = pnand %p898_p10, %p892_p7 }
  0x53   :  { %902 = shalt.err (!%p899_p11)
}
  0x54   :  { %84 = dma.hbm_to_vmem [thread:$0]  %s1178_s7, 1024, %s79_s16, [#allocation9], %s958_s23, %s958_s23, %s959_s24  }
  0x55   :  { %947 = dma.done.wait [#allocation3], 64  }
  0x56   :  { %948 = vsyncadd [#allocation3], 4294967232 }
  0x57   :  { %949 = dma.done.wait [#allocation6], 2048  }
  0x58   :  { %950 = vsyncadd [#allocation6], 4294965248 }
  0x59   :  { %951 = dma.done.wait [#allocation9], 2048  }
  0x5a   :  { %952 = vsyncadd [#allocation9], 4294965248  ;;  %v964_v0 = vmov 0.0   ;;  %vm965_vm0 = vmmov 0   ;;  %v757_v1 = vld [vmem:[#allocation5] sm:$0xff]   ;;  %v758_v2 = vld [vmem:[#allocation5 + $0x8] sm:$0xff]  }
  0x5b   :  { %666 = vmatprep.subr.bf16.mxu0 %v964_v0  ;;  %682 = vmatprep.mubr.msk.bf16.mxu0 %vm965_vm0, %v964_v0  ;;  %v759_v3 = vld [vmem:[#allocation5 + $0x10] sm:$0xff]   ;;  %v765_v4 = vld [vmem:[#allocation7] sm:$0xff]   ;;  %v760_v5 = vld [vmem:[#allocation5 + $0x18] sm:$0xff]  }
  0x5c   :  { %686 = vmatprep.subr.bf16.mxu1 %v964_v0  ;;  %702 = vmatprep.mubr.msk.bf16.mxu1 %vm965_vm0, %v964_v0  ;;  %v766_v6 = vld [vmem:[#allocation7 + $0x8] sm:$0xff]   ;;  %v761_v7 = vld [vmem:[#allocation5 + $0x20] sm:$0xff]   ;;  %v767_v8 = vld [vmem:[#allocation7 + $0x10] sm:$0xff]  }
  0x5d   :  { %667 = vmatpush3.bf16.msra.mxu0 %v757_v1  ;;  %687 = vmatpush3.bf16.msra.mxu1 %v765_v4  ;;  %v762_v9 = vld [vmem:[#allocation5 + $0x28] sm:$0xff]   ;;  %v768_v10 = vld [vmem:[#allocation7 + $0x18] sm:$0xff]   ;;  %v763_v11 = vld [vmem:[#allocation5 + $0x30] sm:$0xff]  }
  0x5e   :  { %668 = vmatprep.subr.bf16.mxu0 %v964_v0  ;;  %688 = vmatprep.subr.bf16.mxu1 %v964_v0  ;;  %v769_v12 = vld [vmem:[#allocation7 + $0x20] sm:$0xff]   ;;  %v764_v13 = vld [vmem:[#allocation5 + $0x38] sm:$0xff]   ;;  %v770_v14 = vld [vmem:[#allocation7 + $0x28] sm:$0xff]  }
  0x5f   :  { %v103_v15 = vld [vmem:[#allocation2] sm:$0xf]  ;;  %v771_v16 = vld [vmem:[#allocation7 + $0x30] sm:$0xff]   ;;  %v773_v18 = vld [vmem:[#allocation8] sm:$0xff]  }
  0x60   :  { %v772_v17 = vld [vmem:[#allocation7 + $0x38] sm:$0xff]   ;;  %v774_v19 = vld [vmem:[#allocation8 + $0x8] sm:$0xff]   ;;  %v775_v20 = vld [vmem:[#allocation8 + $0x10] sm:$0xff]  }
  0x61   :  { %669 = vmatpush3.bf16.msra.mxu0 %v758_v2  ;;  %689 = vmatpush3.bf16.msra.mxu1 %v766_v6  ;;  %v776_v21 = vld [vmem:[#allocation8 + $0x18] sm:$0xff]   ;;  %v777_v22 = vld [vmem:[#allocation8 + $0x20] sm:$0xff]   ;;  %v778_v23 = vld [vmem:[#allocation8 + $0x28] sm:$0xff]  }
  0x62   :  { %670 = vmatprep.subr.bf16.mxu0 %v964_v0  ;;  %690 = vmatprep.subr.bf16.mxu1 %v964_v0  ;;  %v593_v24 = vld [vmem:[%s1173_s2] ss:$0 sm:$0xff]  ;;  %v779_v32 = vld [vmem:[#allocation8 + $0x30] sm:$0xff]   ;;  %v781_v34 = vld [vmem:[#allocation10] sm:$0xff]  }
  0x63   :  { %v780_v33 = vld [vmem:[#allocation8 + $0x38] sm:$0xff]   ;;  %v782_v35 = vld [vmem:[#allocation10 + $0x8] sm:$0xff]   ;;  %v783_v36 = vld [vmem:[#allocation10 + $0x10] sm:$0xff]  }
  0x64   :  { %v784_v37 = vld [vmem:[#allocation10 + $0x18] sm:$0xff]   ;;  %v785_v38 = vld [vmem:[#allocation10 + $0x20] sm:$0xff]   ;;  %v786_v39 = vld [vmem:[#allocation10 + $0x28] sm:$0xff]  }
  0x65   :  { %671 = vmatpush3.bf16.msra.mxu0 %v759_v3  ;;  %691 = vmatpush3.bf16.msra.mxu1 %v767_v8  ;;  %v602_v40 = vld [vmem:[%s1175_s4] ss:$0 sm:$0xff]  ;;  %v787_v48 = vld [vmem:[#allocation10 + $0x30] sm:$0xff]   ;;  %s966_s4 = smov [#allocation11]  }
  0x66   :  { %672 = vmatprep.subr.bf16.mxu0 %v964_v0  ;;  %692 = vmatprep.subr.bf16.mxu1 %v964_v0  ;;  %v788_v49 = vld [vmem:[#allocation10 + $0x38] sm:$0xff]   ;;  %s568_s17 = sshll.u32 %s966_s4, 4  ;;  %s569_s17 = int_to_ptr.vmem [resolvable:$true] %s568_s17 }
  0x67   :  { %v611_v50 = vld [vmem:[%s1177_s6] ss:$0 sm:$0xff]  ;;  %s903_s18 = scalar_lea.vmem %s569_s17, 128  ;;  %p908_p13 = scmp.lt.s32.totalorder %s569_s17, %s569_s17 }
  0x68   :  { %p904_p12 = scmp.ne.s32.totalorder %s569_s17, %s903_s18  ;;  %p909_p0 = scmp.lt.s32.totalorder %s903_s18, %s903_s18 }
  0x69   :  { %673 = vmatpush3.bf16.msra.mxu0 %v760_v5  ;;  %693 = vmatpush3.bf16.msra.mxu1 %v768_v10 }
  0x6a   :  { %674 = vmatprep.subr.bf16.mxu0 %v964_v0  ;;  %694 = vmatprep.subr.bf16.mxu1 %v964_v0  ;;  %p910_p1 = por %p909_p0, %p908_p13 }
  0x6c   :  { %p911_p2 = pnand %p910_p1, %p904_p12 }
  0x6d   :  { %675 = vmatpush3.bf16.msra.mxu0 %v761_v7  ;;  %695 = vmatpush3.bf16.msra.mxu1 %v769_v12 }
  0x6e   :  { %676 = vmatprep.subr.bf16.mxu0 %v964_v0  ;;  %696 = vmatprep.subr.bf16.mxu1 %v964_v0 }
  0x71   :  { %677 = vmatpush3.bf16.msra.mxu0 %v762_v9  ;;  %697 = vmatpush3.bf16.msra.mxu1 %v770_v14 }
  0x72   :  { %678 = vmatprep.subr.bf16.mxu0 %v964_v0  ;;  %698 = vmatprep.subr.bf16.mxu1 %v964_v0 }
  0x75   :  { %679 = vmatpush3.bf16.msra.mxu0 %v763_v11  ;;  %699 = vmatpush3.bf16.msra.mxu1 %v771_v16 }
  0x76   :  { %680 = vmatprep.subr.bf16.mxu0 %v964_v0  ;;  %700 = vmatprep.subr.bf16.mxu1 %v964_v0 }
  0x79   :  { %681 = vmatpush3.bf16.msra.mxu0 %v764_v13  ;;  %701 = vmatpush3.bf16.msra.mxu1 %v772_v17 }
  0x7a   :  { %706 = vmatprep.subr.bf16.mxu0 %v964_v0  ;;  %726 = vmatprep.subr.bf16.mxu1 %v964_v0 }
  0x7c   :  { %683 = vmatmul.mubr.bf16.vlgmr.msra.gmra.mrb[0].mxu0 %v103_v15 }
  0x7d   :  { %722 = vmatprep.mubr.msk.bf16.mxu0 %vm965_vm0, %v964_v0  ;;  %707 = vmatpush3.bf16.msra.mxu0 %v773_v18 }
  0x7e   :  { %708 = vmatprep.subr.bf16.mxu0 %v964_v0 }
  0x81   :  { %709 = vmatpush3.bf16.msra.mxu0 %v774_v19 }
  0x82   :  { %710 = vmatprep.subr.bf16.mxu0 %v964_v0 }
  0x85   :  { %711 = vmatpush3.bf16.msra.mxu0 %v775_v20 }
  0x86   :  { %712 = vmatprep.subr.bf16.mxu0 %v964_v0 }
  0x89   :  { %713 = vmatpush3.bf16.msra.mxu0 %v776_v21 }
  0x8a   :  { %714 = vmatprep.subr.bf16.mxu0 %v964_v0 }
  0x8d   :  { %715 = vmatpush3.bf16.msra.mxu0 %v777_v22 }
  0x8e   :  { %716 = vmatprep.subr.bf16.mxu0 %v964_v0 }
  0x91   :  { %717 = vmatpush3.bf16.msra.mxu0 %v778_v23 }
  0x92   :  { %718 = vmatprep.subr.bf16.mxu0 %v964_v0 }
  0x95   :  { %719 = vmatpush3.bf16.msra.mxu0 %v779_v32 }
  0x96   :  { %720 = vmatprep.subr.bf16.mxu0 %v964_v0 }
  0x99   :  { %721 = vmatpush3.bf16.msra.mxu0 %v780_v33 }
 0x14f   :  { %v209_v25 = vpop.f32.mrb[0].mxu0 }
 0x150   :  { %v210_v26 = vadd.f32 %v593_v24, %v209_v25  ;;  %v684_v27 = vpop.f32.mrb[1].mxu0 }
 0x151   :  { %v212_v28 = vpop.f32.mrb[2].mxu0 }
 0x152   :  { %v215_v29 = vmax.f32 %v210_v26, 0.0  ;;  %v685_v30 = vpop.f32.mrb[3].mxu0 }
 0x154   :  { %v216_v31 = vpack.c.bf16 %v215_v29, %v215_v29 }
 0x156   :  { %703 = vmatmul.mubr.bf16.vlgmr.msra.gmra.mrb[0].mxu1 %v216_v31 }
 0x157   :  { %742 = vmatprep.mubr.msk.bf16.mxu1 %vm965_vm0, %v964_v0  ;;  %727 = vmatpush3.bf16.msra.mxu1 %v781_v34 }
 0x158   :  { %728 = vmatprep.subr.bf16.mxu1 %v964_v0 }
 0x15b   :  { %729 = vmatpush3.bf16.msra.mxu1 %v782_v35 }
 0x15c   :  { %730 = vmatprep.subr.bf16.mxu1 %v964_v0 }
 0x15f   :  { %731 = vmatpush3.bf16.msra.mxu1 %v783_v36 }
 0x160   :  { %732 = vmatprep.subr.bf16.mxu1 %v964_v0 }
 0x163   :  { %733 = vmatpush3.bf16.msra.mxu1 %v784_v37 }
 0x164   :  { %734 = vmatprep.subr.bf16.mxu1 %v964_v0 }
 0x167   :  { %735 = vmatpush3.bf16.msra.mxu1 %v785_v38 }
 0x168   :  { %736 = vmatprep.subr.bf16.mxu1 %v964_v0 }
 0x16b   :  { %737 = vmatpush3.bf16.msra.mxu1 %v786_v39 }
 0x16c   :  { %738 = vmatprep.subr.bf16.mxu1 %v964_v0 }
 0x16f   :  { %739 = vmatpush3.bf16.msra.mxu1 %v787_v48 }
 0x170   :  { %740 = vmatprep.subr.bf16.mxu1 %v964_v0 }
 0x173   :  { %741 = vmatpush3.bf16.msra.mxu1 %v788_v49 }
 0x229   :  { %v322_v41 = vpop.f32.mrb[0].mxu1 }
 0x22a   :  { %v323_v42 = vadd.f32 %v602_v40, %v322_v41  ;;  %v704_v43 = vpop.f32.mrb[1].mxu1 }
 0x22b   :  { %v325_v44 = vpop.f32.mrb[2].mxu1 }
 0x22c   :  { %v328_v45 = vmax.f32 %v323_v42, 0.0  ;;  %v705_v46 = vpop.f32.mrb[3].mxu1 }
 0x22e   :  { %v330_v47 = vpack.c.bf16 %v328_v45, %v328_v45  ;;  %329 = vst [vmem:[#allocation11] sm:$0xff] %v328_v45 }
 0x230   :  { %723 = vmatmul.mubr.bf16.vlgmr.msra.gmra.mrb[4].mxu0 %v330_v47 }
 0x303   :  { %v436_v51 = vpop.f32.mrb[4].mxu0 }
 0x304   :  { %v437_v52 = vadd.f32 %v611_v50, %v436_v51  ;;  %v724_v53 = vpop.f32.mrb[5].mxu0 }
 0x305   :  { %v439_v54 = vpop.f32.mrb[6].mxu0 }
 0x306   :  { %v442_v55 = vmax.f32 %v437_v52, 0.0  ;;  %v725_v56 = vpop.f32.mrb[7].mxu0 }
 0x308   :  { %v443_v57 = vpack.c.bf16 %v442_v55, %v442_v55 }
 0x30a   :  { %743 = vmatmul.mubr.bf16.vlgmr.msra.gmra.mrb[4].mxu1 %v443_v57 }
 0x30b   :  { %914 = shalt.err (!%p911_p2)
}
 0x30c   :  { %s915_s14 = scalar_lea.hbm %s1180_s9, 128 }
 0x30d   :  { %p916_p3 = scmp.ne.s32.totalorder %s1180_s9, %s915_s14  ;;  %p919_p4 = scmp.lt.u32.totalorder %s915_s14, %s1180_s9 }
 0x30f   :  { %p921_p5 = pnand %p919_p4, %p916_p3 }
 0x311   :  { %924 = shalt.err (!%p921_p5)
}
 0x312   :  { %571 = dma.vmem_to_hbm [thread:$0]  %s569_s17, 128, %s1180_s9, [#allocation4]   ;;  %v620_v58 = vld [vmem:[%s1179_s8] ss:$0 sm:$0xff] }
 0x313   :  { %s967_s27 = smov [#allocation12]  }
 0x314   :  { %s578_s29 = sshll.u32 %s967_s27, 4  ;;  %s579_s29 = int_to_ptr.vmem [resolvable:$true] %s578_s29 }
 0x315   :  { %s925_s9 = scalar_lea.vmem %s579_s29, 128  ;;  %p930_p7 = scmp.lt.s32.totalorder %s579_s29, %s579_s29 }
 0x316   :  { %p926_p6 = scmp.ne.s32.totalorder %s579_s29, %s925_s9  ;;  %p931_p8 = scmp.lt.s32.totalorder %s925_s9, %s925_s9 }
 0x318   :  { %p932_p9 = por %p931_p8, %p930_p7 }
 0x31a   :  { %p933_p10 = pnand %p932_p9, %p926_p6 }
 0x3dd   :  { %v549_v59 = vpop.f32.mrb[4].mxu1 }
 0x3de   :  { %v550_v60 = vadd.f32 %v620_v58, %v549_v59  ;;  %v744_v61 = vpop.f32.mrb[5].mxu1 }
 0x3df   :  { %v552_v62 = vpop.f32.mrb[6].mxu1 }
 0x3e0   :  { %v629_v63 = vmul.f32 -1.442695, %v550_v60  ;;  %v745_v0 = vpop.f32.mrb[7].mxu1 }
 0x3e2   :  { %789 = vpow2.f32 %v629_v63 }
 0x3ec   :  { %v790_v1 = vpop.eup %789 }
 0x3ed   :  { %v558_v2 = vadd.f32 1.0, %v790_v1 }
 0x3ef   :  { %791 = vrcp.f32 %v558_v2 }
 0x3f9   :  { %v792_v3 = vpop.eup %791 }
 0x3fa   :  { %561 = vst [vmem:[#allocation12] sm:$0xff] %v792_v3 }
 0x3fb   :  { %936 = shalt.err (!%p933_p10)
}
 0x3fc   :  { %s937_s5 = scalar_lea.hbm %s1181_s10, 128 }
 0x3fd   :  { %p938_p11 = scmp.ne.s32.totalorder %s1181_s10, %s937_s5  ;;  %p941_p12 = scmp.lt.u32.totalorder %s937_s5, %s1181_s10 }
 0x3ff   :  { %p943_p13 = pnand %p941_p12, %p938_p11 }
 0x401   :  { %946 = shalt.err (!%p943_p13)
}
 0x402   :  { %581 = dma.vmem_to_hbm [thread:$0]  %s579_s29, 128, %s1181_s10, [#allocation13]  }
 0x403   :  { %953 = dma.done.wait [#allocation4], 128  }
 0x404   :  { %954 = vsyncadd [#allocation4], 4294967168 }
 0x405   :  { %955 = dma.done.wait [#allocation13], 128  }
 0x406   :  { %956 = vsyncadd [#allocation13], 4294967168 }
 0x407   :  { %588 = vsyncpa [#allocation3], 1 }
 0x408   :  { %589 = vsyncpa [#allocation6], 1 }
 0x409   :  { %590 = vsyncpa [#allocation9], 1 }
 0x40a   :  { %591 = vsyncpa [#allocation4], 1 }
 0x40b   :  { %592 = vsyncpa [#allocation13], 1 }

// kernel: tpu_custom_call.1
= control target key start
LH: loop header
LB: loop body
LE: loop exit
PB: predicated region body
PF: predicated region fallthrough
CT: control target
= control target key end

     0   :  { %16 = vsyncpa [#allocation3], 0  ;;  %s1171_s0 = inlined_call_operand.hbm [shape: bf16[8,128], index: 0, kind: input, shape index: {}]   ;;  %s1172_s1 = inlined_call_operand.hbm [shape: bf16[128,128], index: 1, kind: input, shape index: {}]   ;;  %s1173_s2 = inlined_call_operand.vmem [shape: f32[1,128], index: 2, kind: input, shape index: {}]   ;;  %s1174_s3 = inlined_call_operand.hbm [shape: bf16[128,128], index: 3, kind: input, shape index: {}]   ;;  %s1175_s4 = inlined_call_operand.vmem [shape: f32[1,128], index: 4, kind: input, shape index: {}]   ;;  %s1176_s5 = inlined_call_operand.hbm [shape: bf16[128,128], index: 5, kind: input, shape index: {}]   ;;  %s1177_s6 = inlined_call_operand.vmem [shape: f32[1,128], index: 6, kind: input, shape index: {}]   ;;  %s1178_s7 = inlined_call_operand.hbm [shape: bf16[128,128], index: 7, kind: input, shape index: {}]   ;;  %s1179_s8 = inlined_call_operand.vmem [shape: f32[1,128], index: 8, kind: input, shape index: {}]   ;;  %s1180_s9 = inlined_call_operand.hbm [shape: f32[8,128], index: 9, kind: output, shape index: {0}]   ;;  %s1181_s10 = inlined_call_operand.hbm [shape: f32[8,128], index: 10, kind: output, shape index: {1}]  }
   0x1   :  { %17 = vsyncpa [#allocation6], 0 }
   0x2   :  { %18 = vsyncpa [#allocation9], 0 }
   0x3   :  { %19 = vsyncpa [#allocation4], 0 }
   0x4   :  { %20 = vsyncpa [#allocation13], 0  ;;  %s957_s13 = smov [#allocation5]   ;;  %s793_s17 = scalar_lea.hbm %s1172_s1, 1024 }
   0x5   :  { %s36_s14 = sshll.u32 %s957_s13, 4  ;;  %p794_p0 = scmp.ne.s32.totalorder %s1172_s1, %s793_s17  ;;  %s37_s14 = int_to_ptr.vmem [resolvable:$true] %s36_s14 }
   0x6   :  { %p797_p1 = scmp.lt.u32.totalorder %s793_s17, %s1172_s1 }
   0x8   :  { %p799_p2 = pnand %p797_p1, %p794_p0 }
   0xa   :  { %802 = shalt.err (!%p799_p2)
}
   0xb   :  { %s803_s22 = scalar_lea.vmem %s37_s14, 1024  ;;  %p808_p4 = scmp.lt.s32.totalorder %s37_s14, %s37_s14 }
   0xc   :  { %p804_p3 = scmp.ne.s32.totalorder %s37_s14, %s803_s22  ;;  %p809_p5 = scmp.lt.s32.totalorder %s803_s22, %s803_s22 }
   0xe   :  { %p810_p6 = por %p809_p5, %p808_p4 }
  0x10   :  { %p811_p7 = pnand %p810_p6, %p804_p3 }
  0x12   :  { %814 = shalt.err (!%p811_p7)
}
  0x13   :  { %s958_s23 = smov 64   ;;  %s959_s24 = smov 4  }
  0x14   :  { %42 = dma.hbm_to_vmem [thread:$0]  %s1172_s1, 1024, %s37_s14, [#allocation6], %s958_s23, %s958_s23, %s959_s24  }
  0x15   :  { %s960_s27 = smov [#allocation8]   ;;  %s961_s29 = smov [#allocation2]  }
  0x16   :  { %s64_s28 = sshll.u32 %s960_s27, 4  ;;  %s27_s30 = sshll.u32 %s961_s29, 4  ;;  %s65_s28 = int_to_ptr.vmem [resolvable:$true] %s64_s28  ;;  %s28_s30 = int_to_ptr.vmem [resolvable:$true] %s27_s30 }
  0x17   :  { %s815_s13 = scalar_lea.hbm %s1176_s5, 1024 }
  0x18   :  { %p816_p8 = scmp.ne.s32.totalorder %s1176_s5, %s815_s13  ;;  %p819_p9 = scmp.lt.u32.totalorder %s815_s13, %s1176_s5 }
  0x1a   :  { %p821_p10 = pnand %p819_p9, %p816_p8 }
  0x1c   :  { %824 = shalt.err (!%p821_p10)
}
  0x1d   :  { %s825_s1 = scalar_lea.vmem %s65_s28, 1024  ;;  %p830_p12 = scmp.lt.s32.totalorder %s65_s28, %s65_s28 }
  0x1e   :  { %p826_p11 = scmp.ne.s32.totalorder %s65_s28, %s825_s1  ;;  %p831_p13 = scmp.lt.s32.totalorder %s825_s1, %s825_s1 }
  0x20   :  { %p832_p0 = por %p831_p13, %p830_p12 }
  0x22   :  { %p833_p1 = pnand %p832_p0, %p826_p11 }
  0x24   :  { %836 = shalt.err (!%p833_p1)
}
  0x25   :  { %70 = dma.hbm_to_vmem [thread:$0]  %s1176_s5, 1024, %s65_s28, [#allocation9], %s958_s23, %s958_s23, %s959_s24  }
  0x26   :  { %s837_s22 = scalar_lea.hbm %s1171_s0, 64 }
  0x27   :  { %p838_p2 = scmp.ne.s32.totalorder %s1171_s0, %s837_s22  ;;  %p841_p3 = scmp.lt.u32.totalorder %s837_s22, %s1171_s0 }
  0x29   :  { %p843_p4 = pnand %p841_p3, %p838_p2 }
  0x2b   :  { %846 = shalt.err (!%p843_p4)
}
  0x2c   :  { %s847_s11 = scalar_lea.vmem %s28_s30, 64  ;;  %p852_p6 = scmp.lt.s32.totalorder %s28_s30, %s28_s30 }
  0x2d   :  { %p848_p5 = scmp.ne.s32.totalorder %s28_s30, %s847_s11  ;;  %p853_p7 = scmp.lt.s32.totalorder %s847_s11, %s847_s11 }
  0x2f   :  { %p854_p8 = por %p853_p7, %p852_p6 }
  0x31   :  { %p855_p9 = pnand %p854_p8, %p848_p5 }
  0x33   :  { %858 = shalt.err (!%p855_p9)
}
  0x34   :  { %30 = dma.hbm_to_vmem [thread:$0]  %s1171_s0, 64, %s28_s30, [#allocation3]  }
  0x35   :  { %s962_s12 = smov [#allocation7]   ;;  %s963_s15 = smov [#allocation10]  }
  0x36   :  { %s50_s13 = sshll.u32 %s962_s12, 4  ;;  %s78_s16 = sshll.u32 %s963_s15, 4  ;;  %s51_s13 = int_to_ptr.vmem [resolvable:$true] %s50_s13  ;;  %s79_s16 = int_to_ptr.vmem [resolvable:$true] %s78_s16 }
  0x37   :  { %s859_s1 = scalar_lea.hbm %s1174_s3, 1024 }
  0x38   :  { %p860_p10 = scmp.ne.s32.totalorder %s1174_s3, %s859_s1  ;;  %p863_p11 = scmp.lt.u32.totalorder %s859_s1, %s1174_s3 }
  0x3a   :  { %p865_p12 = pnand %p863_p11, %p860_p10 }
  0x3c   :  { %868 = shalt.err (!%p865_p12)
}
  0x3d   :  { %s869_s0 = scalar_lea.vmem %s51_s13, 1024  ;;  %p874_p0 = scmp.lt.s32.totalorder %s51_s13, %s51_s13 }
  0x3e   :  { %p870_p13 = scmp.ne.s32.totalorder %s51_s13, %s869_s0  ;;  %p875_p1 = scmp.lt.s32.totalorder %s869_s0, %s869_s0 }
  0x40   :  { %p876_p2 = por %p875_p1, %p874_p0 }
  0x42   :  { %p877_p3 = pnand %p876_p2, %p870_p13 }
  0x44   :  { %880 = shalt.err (!%p877_p3)
}
  0x45   :  { %56 = dma.hbm_to_vmem [thread:$0]  %s1174_s3, 1024, %s51_s13, [#allocation6], %s958_s23, %s958_s23, %s959_s24  }
  0x46   :  { %s881_s27 = scalar_lea.hbm %s1178_s7, 1024 }
  0x47   :  { %p882_p4 = scmp.ne.s32.totalorder %s1178_s7, %s881_s27  ;;  %p885_p5 = scmp.lt.u32.totalorder %s881_s27, %s1178_s7 }
  0x49   :  { %p887_p6 = pnand %p885_p5, %p882_p4 }
  0x4b   :  { %890 = shalt.err (!%p887_p6)
}
  0x4c   :  { %s891_s12 = scalar_lea.vmem %s79_s16, 1024  ;;  %p896_p8 = scmp.lt.s32.totalorder %s79_s16, %s79_s16 }
  0x4d   :  { %p892_p7 = scmp.ne.s32.totalorder %s79_s16, %s891_s12  ;;  %p897_p9 = scmp.lt.s32.totalorder %s891_s12, %s891_s12 }
  0x4f   :  { %p898_p10 = por %p897_p9, %p896_p8 }
  0x51   :  { %p899_p11 = pnand %p898_p10, %p892_p7 }
  0x53   :  { %902 = shalt.err (!%p899_p11)
}
  0x54   :  { %84 = dma.hbm_to_vmem [thread:$0]  %s1178_s7, 1024, %s79_s16, [#allocation9], %s958_s23, %s958_s23, %s959_s24  }
  0x55   :  { %947 = dma.done.wait [#allocation3], 64  }
  0x56   :  { %948 = vsyncadd [#allocation3], 4294967232 }
  0x57   :  { %949 = dma.done.wait [#allocation6], 2048  }
  0x58   :  { %950 = vsyncadd [#allocation6], 4294965248 }
  0x59   :  { %951 = dma.done.wait [#allocation9], 2048  }
  0x5a   :  { %952 = vsyncadd [#allocation9], 4294965248  ;;  %v964_v0 = vmov 0.0   ;;  %vm965_vm0 = vmmov 0   ;;  %v757_v1 = vld [vmem:[#allocation5] sm:$0xff]   ;;  %v758_v2 = vld [vmem:[#allocation5 + $0x8] sm:$0xff]  }
  0x5b   :  { %666 = vmatprep.subr.bf16.mxu0 %v964_v0  ;;  %682 = vmatprep.mubr.msk.bf16.mxu0 %vm965_vm0, %v964_v0  ;;  %v759_v3 = vld [vmem:[#allocation5 + $0x10] sm:$0xff]   ;;  %v765_v4 = vld [vmem:[#allocation7] sm:$0xff]   ;;  %v760_v5 = vld [vmem:[#allocation5 + $0x18] sm:$0xff]  }
  0x5c   :  { %686 = vmatprep.subr.bf16.mxu1 %v964_v0  ;;  %702 = vmatprep.mubr.msk.bf16.mxu1 %vm965_vm0, %v964_v0  ;;  %v766_v6 = vld [vmem:[#allocation7 + $0x8] sm:$0xff]   ;;  %v761_v7 = vld [vmem:[#allocation5 + $0x20] sm:$0xff]   ;;  %v767_v8 = vld [vmem:[#allocation7 + $0x10] sm:$0xff]  }
  0x5d   :  { %667 = vmatpush3.bf16.msra.mxu0 %v757_v1  ;;  %687 = vmatpush3.bf16.msra.mxu1 %v765_v4  ;;  %v762_v9 = vld [vmem:[#allocation5 + $0x28] sm:$0xff]   ;;  %v768_v10 = vld [vmem:[#allocation7 + $0x18] sm:$0xff]   ;;  %v763_v11 = vld [vmem:[#allocation5 + $0x30] sm:$0xff]  }
  0x5e   :  { %668 = vmatprep.subr.bf16.mxu0 %v964_v0  ;;  %688 = vmatprep.subr.bf16.mxu1 %v964_v0  ;;  %v769_v12 = vld [vmem:[#allocation7 + $0x20] sm:$0xff]   ;;  %v764_v13 = vld [vmem:[#allocation5 + $0x38] sm:$0xff]   ;;  %v770_v14 = vld [vmem:[#allocation7 + $0x28] sm:$0xff]  }
  0x5f   :  { %v103_v15 = vld [vmem:[#allocation2] sm:$0xf]  ;;  %v771_v16 = vld [vmem:[#allocation7 + $0x30] sm:$0xff]   ;;  %v773_v18 = vld [vmem:[#allocation8] sm:$0xff]  }
  0x60   :  { %v772_v17 = vld [vmem:[#allocation7 + $0x38] sm:$0xff]   ;;  %v774_v19 = vld [vmem:[#allocation8 + $0x8] sm:$0xff]   ;;  %v775_v20 = vld [vmem:[#allocation8 + $0x10] sm:$0xff]  }
  0x61   :  { %669 = vmatpush3.bf16.msra.mxu0 %v758_v2  ;;  %689 = vmatpush3.bf16.msra.mxu1 %v766_v6  ;;  %v776_v21 = vld [vmem:[#allocation8 + $0x18] sm:$0xff]   ;;  %v777_v22 = vld [vmem:[#allocation8 + $0x20] sm:$0xff]   ;;  %v778_v23 = vld [vmem:[#allocation8 + $0x28] sm:$0xff]  }
  0x62   :  { %670 = vmatprep.subr.bf16.mxu0 %v964_v0  ;;  %690 = vmatprep.subr.bf16.mxu1 %v964_v0  ;;  %v593_v24 = vld [vmem:[%s1173_s2] ss:$0 sm:$0xff]  ;;  %v779_v32 = vld [vmem:[#allocation8 + $0x30] sm:$0xff]   ;;  %v781_v34 = vld [vmem:[#allocation10] sm:$0xff]  }
  0x63   :  { %v780_v33 = vld [vmem:[#allocation8 + $0x38] sm:$0xff]   ;;  %v782_v35 = vld [vmem:[#allocation10 + $0x8] sm:$0xff]   ;;  %v783_v36 = vld [vmem:[#allocation10 + $0x10] sm:$0xff]  }
  0x64   :  { %v784_v37 = vld [vmem:[#allocation10 + $0x18] sm:$0xff]   ;;  %v785_v38 = vld [vmem:[#allocation10 + $0x20] sm:$0xff]   ;;  %v786_v39 = vld [vmem:[#allocation10 + $0x28] sm:$0xff]  }
  0x65   :  { %671 = vmatpush3.bf16.msra.mxu0 %v759_v3  ;;  %691 = vmatpush3.bf16.msra.mxu1 %v767_v8  ;;  %v602_v40 = vld [vmem:[%s1175_s4] ss:$0 sm:$0xff]  ;;  %v787_v48 = vld [vmem:[#allocation10 + $0x30] sm:$0xff]   ;;  %s966_s4 = smov [#allocation11]  }
  0x66   :  { %672 = vmatprep.subr.bf16.mxu0 %v964_v0  ;;  %692 = vmatprep.subr.bf16.mxu1 %v964_v0  ;;  %v788_v49 = vld [vmem:[#allocation10 + $0x38] sm:$0xff]   ;;  %s568_s17 = sshll.u32 %s966_s4, 4  ;;  %s569_s17 = int_to_ptr.vmem [resolvable:$true] %s568_s17 }
  0x67   :  { %v611_v50 = vld [vmem:[%s1177_s6] ss:$0 sm:$0xff]  ;;  %s903_s18 = scalar_lea.vmem %s569_s17, 128  ;;  %p908_p13 = scmp.lt.s32.totalorder %s569_s17, %s569_s17 }
  0x68   :  { %p904_p12 = scmp.ne.s32.totalorder %s569_s17, %s903_s18  ;;  %p909_p0 = scmp.lt.s32.totalorder %s903_s18, %s903_s18 }
  0x69   :  { %673 = vmatpush3.bf16.msra.mxu0 %v760_v5  ;;  %693 = vmatpush3.bf16.msra.mxu1 %v768_v10 }
  0x6a   :  { %674 = vmatprep.subr.bf16.mxu0 %v964_v0  ;;  %694 = vmatprep.subr.bf16.mxu1 %v964_v0  ;;  %p910_p1 = por %p909_p0, %p908_p13 }
  0x6c   :  { %p911_p2 = pnand %p910_p1, %p904_p12 }
  0x6d   :  { %675 = vmatpush3.bf16.msra.mxu0 %v761_v7  ;;  %695 = vmatpush3.bf16.msra.mxu1 %v769_v12 }
  0x6e   :  { %676 = vmatprep.subr.bf16.mxu0 %v964_v0  ;;  %696 = vmatprep.subr.bf16.mxu1 %v964_v0 }
  0x71   :  { %677 = vmatpush3.bf16.msra.mxu0 %v762_v9  ;;  %697 = vmatpush3.bf16.msra.mxu1 %v770_v14 }
  0x72   :  { %678 = vmatprep.subr.bf16.mxu0 %v964_v0  ;;  %698 = vmatprep.subr.bf16.mxu1 %v964_v0 }
  0x75   :  { %679 = vmatpush3.bf16.msra.mxu0 %v763_v11  ;;  %699 = vmatpush3.bf16.msra.mxu1 %v771_v16 }
  0x76   :  { %680 = vmatprep.subr.bf16.mxu0 %v964_v0  ;;  %700 = vmatprep.subr.bf16.mxu1 %v964_v0 }
  0x79   :  { %681 = vmatpush3.bf16.msra.mxu0 %v764_v13  ;;  %701 = vmatpush3.bf16.msra.mxu1 %v772_v17 }
  0x7a   :  { %706 = vmatprep.subr.bf16.mxu0 %v964_v0  ;;  %726 = vmatprep.subr.bf16.mxu1 %v964_v0 }
  0x7c   :  { %683 = vmatmul.mubr.bf16.vlgmr.msra.gmra.mrb[0].mxu0 %v103_v15 }
  0x7d   :  { %722 = vmatprep.mubr.msk.bf16.mxu0 %vm965_vm0, %v964_v0  ;;  %707 = vmatpush3.bf16.msra.mxu0 %v773_v18 }
  0x7e   :  { %708 = vmatprep.subr.bf16.mxu0 %v964_v0 }
  0x81   :  { %709 = vmatpush3.bf16.msra.mxu0 %v774_v19 }
  0x82   :  { %710 = vmatprep.subr.bf16.mxu0 %v964_v0 }
  0x85   :  { %711 = vmatpush3.bf16.msra.mxu0 %v775_v20 }
  0x86   :  { %712 = vmatprep.subr.bf16.mxu0 %v964_v0 }
  0x89   :  { %713 = vmatpush3.bf16.msra.mxu0 %v776_v21 }
  0x8a   :  { %714 = vmatprep.subr.bf16.mxu0 %v964_v0 }
  0x8d   :  { %715 = vmatpush3.bf16.msra.mxu0 %v777_v22 }
  0x8e   :  { %716 = vmatprep.subr.bf16.mxu0 %v964_v0 }
  0x91   :  { %717 = vmatpush3.bf16.msra.mxu0 %v778_v23 }
  0x92   :  { %718 = vmatprep.subr.bf16.mxu0 %v964_v0 }
  0x95   :  { %719 = vmatpush3.bf16.msra.mxu0 %v779_v32 }
  0x96   :  { %720 = vmatprep.subr.bf16.mxu0 %v964_v0 }
  0x99   :  { %721 = vmatpush3.bf16.msra.mxu0 %v780_v33 }
 0x14f   :  { %v209_v25 = vpop.f32.mrb[0].mxu0 }
 0x150   :  { %v210_v26 = vadd.f32 %v593_v24, %v209_v25  ;;  %v684_v27 = vpop.f32.mrb[1].mxu0 }
 0x151   :  { %v212_v28 = vpop.f32.mrb[2].mxu0 }
 0x152   :  { %v215_v29 = vmax.f32 %v210_v26, 0.0  ;;  %v685_v30 = vpop.f32.mrb[3].mxu0 }
 0x154   :  { %v216_v31 = vpack.c.bf16 %v215_v29, %v215_v29 }
 0x156   :  { %703 = vmatmul.mubr.bf16.vlgmr.msra.gmra.mrb[0].mxu1 %v216_v31 }
 0x157   :  { %742 = vmatprep.mubr.msk.bf16.mxu1 %vm965_vm0, %v964_v0  ;;  %727 = vmatpush3.bf16.msra.mxu1 %v781_v34 }
 0x158   :  { %728 = vmatprep.subr.bf16.mxu1 %v964_v0 }
 0x15b   :  { %729 = vmatpush3.bf16.msra.mxu1 %v782_v35 }
 0x15c   :  { %730 = vmatprep.subr.bf16.mxu1 %v964_v0 }
 0x15f   :  { %731 = vmatpush3.bf16.msra.mxu1 %v783_v36 }
 0x160   :  { %732 = vmatprep.subr.bf16.mxu1 %v964_v0 }
 0x163   :  { %733 = vmatpush3.bf16.msra.mxu1 %v784_v37 }
 0x164   :  { %734 = vmatprep.subr.bf16.mxu1 %v964_v0 }
 0x167   :  { %735 = vmatpush3.bf16.msra.mxu1 %v785_v38 }
 0x168   :  { %736 = vmatprep.subr.bf16.mxu1 %v964_v0 }
 0x16b   :  { %737 = vmatpush3.bf16.msra.mxu1 %v786_v39 }
 0x16c   :  { %738 = vmatprep.subr.bf16.mxu1 %v964_v0 }
 0x16f   :  { %739 = vmatpush3.bf16.msra.mxu1 %v787_v48 }
 0x170   :  { %740 = vmatprep.subr.bf16.mxu1 %v964_v0 }
 0x173   :  { %741 = vmatpush3.bf16.msra.mxu1 %v788_v49 }
 0x229   :  { %v322_v41 = vpop.f32.mrb[0].mxu1 }
 0x22a   :  { %v323_v42 = vadd.f32 %v602_v40, %v322_v41  ;;  %v704_v43 = vpop.f32.mrb[1].mxu1 }
 0x22b   :  { %v325_v44 = vpop.f32.mrb[2].mxu1 }
 0x22c   :  { %v328_v45 = vmax.f32 %v323_v42, 0.0  ;;  %v705_v46 = vpop.f32.mrb[3].mxu1 }
 0x22e   :  { %v330_v47 = vpack.c.bf16 %v328_v45, %v328_v45  ;;  %329 = vst [vmem:[#allocation11] sm:$0xff] %v328_v45 }
 0x230   :  { %723 = vmatmul.mubr.bf16.vlgmr.msra.gmra.mrb[4].mxu0 %v330_v47 }
 0x303   :  { %v436_v51 = vpop.f32.mrb[4].mxu0 }
 0x304   :  { %v437_v52 = vadd.f32 %v611_v50, %v436_v51  ;;  %v724_v53 = vpop.f32.mrb[5].mxu0 }
 0x305   :  { %v439_v54 = vpop.f32.mrb[6].mxu0 }
 0x306   :  { %v442_v55 = vmax.f32 %v437_v52, 0.0  ;;  %v725_v56 = vpop.f32.mrb[7].mxu0 }
 0x308   :  { %v443_v57 = vpack.c.bf16 %v442_v55, %v442_v55 }
 0x30a   :  { %743 = vmatmul.mubr.bf16.vlgmr.msra.gmra.mrb[4].mxu1 %v443_v57 }
 0x30b   :  { %914 = shalt.err (!%p911_p2)
}
 0x30c   :  { %s915_s14 = scalar_lea.hbm %s1180_s9, 128 }
 0x30d   :  { %p916_p3 = scmp.ne.s32.totalorder %s1180_s9, %s915_s14  ;;  %p919_p4 = scmp.lt.u32.totalorder %s915_s14, %s1180_s9 }
 0x30f   :  { %p921_p5 = pnand %p919_p4, %p916_p3 }
 0x311   :  { %924 = shalt.err (!%p921_p5)
}
 0x312   :  { %571 = dma.vmem_to_hbm [thread:$0]  %s569_s17, 128, %s1180_s9, [#allocation4]   ;;  %v620_v58 = vld [vmem:[%s1179_s8] ss:$0 sm:$0xff] }
 0x313   :  { %s967_s27 = smov [#allocation12]  }
 0x314   :  { %s578_s29 = sshll.u32 %s967_s27, 4  ;;  %s579_s29 = int_to_ptr.vmem [resolvable:$true] %s578_s29 }
 0x315   :  { %s925_s9 = scalar_lea.vmem %s579_s29, 128  ;;  %p930_p7 = scmp.lt.s32.totalorder %s579_s29, %s579_s29 }
 0x316   :  { %p926_p6 = scmp.ne.s32.totalorder %s579_s29, %s925_s9  ;;  %p931_p8 = scmp.lt.s32.totalorder %s925_s9, %s925_s9 }
 0x318   :  { %p932_p9 = por %p931_p8, %p930_p7 }
 0x31a   :  { %p933_p10 = pnand %p932_p9, %p926_p6 }
 0x3dd   :  { %v549_v59 = vpop.f32.mrb[4].mxu1 }
 0x3de   :  { %v550_v60 = vadd.f32 %v620_v58, %v549_v59  ;;  %v744_v61 = vpop.f32.mrb[5].mxu1 }
 0x3df   :  { %v552_v62 = vpop.f32.mrb[6].mxu1 }
 0x3e0   :  { %v629_v63 = vmul.f32 -1.442695, %v550_v60  ;;  %v745_v0 = vpop.f32.mrb[7].mxu1 }
 0x3e2   :  { %789 = vpow2.f32 %v629_v63 }
 0x3ec   :  { %v790_v1 = vpop.eup %789 }
 0x3ed   :  { %v558_v2 = vadd.f32 1.0, %v790_v1 }
 0x3ef   :  { %791 = vrcp.f32 %v558_v2 }
 0x3f9   :  { %v792_v3 = vpop.eup %791 }
 0x3fa   :  { %561 = vst [vmem:[#allocation12] sm:$0xff] %v792_v3 }
 0x3fb   :  { %936 = shalt.err (!%p933_p10)
}
 0x3fc   :  { %s937_s5 = scalar_lea.hbm %s1181_s10, 128 }
 0x3fd   :  { %p938_p11 = scmp.ne.s32.totalorder %s1181_s10, %s937_s5  ;;  %p941_p12 = scmp.lt.u32.totalorder %s937_s5, %s1181_s10 }
 0x3ff   :  { %p943_p13 = pnand %p941_p12, %p938_p11 }
 0x401   :  { %946 = shalt.err (!%p943_p13)
}
 0x402   :  { %581 = dma.vmem_to_hbm [thread:$0]  %s579_s29, 128, %s1181_s10, [#allocation13]  }
 0x403   :  { %953 = dma.done.wait [#allocation4], 128  }
 0x404   :  { %954 = vsyncadd [#allocation4], 4294967168 }
 0x405   :  { %955 = dma.done.wait [#allocation13], 128  }
 0x406   :  { %956 = vsyncadd [#allocation13], 4294967168 }
 0x407   :  { %588 = vsyncpa [#allocation3], 1 }
 0x408   :  { %589 = vsyncpa [#allocation6], 1 }
 0x409   :  { %590 = vsyncpa [#allocation9], 1 }
 0x40a   :  { %591 = vsyncpa [#allocation4], 1 }
 0x40b   :  { %592 = vsyncpa [#allocation13], 1 }

</bundles_post_ra>
